<compile_context>
chip_gen: v7x
topology: tpu7x:2x2x1
jax: 0.10.0
libtpu: 0.0.40
codegen_flags: <defaults>
</compile_context>

<pallas_src>
import functools

import jax
import jax.numpy as jnp
from jax.experimental import pallas as pl
from jax.experimental.pallas import tpu as pltpu


def literal_kernel(x_ref, vec_ref, wfc_ref, wz_ref, wt_ref, wout_ref, o_ref,
                   *, inv_h, hp):
    """Fused fc -> LayerNorm -> ReLU -> gated residual -> fc_out.

    x_ref   : (TM, Hp)   bf16  padded [entity_emb | attr_emb] batch tile
    vec_ref : (8, Hp)    f32   row 0 mask, 1 b_fc, 2 gamma, 3 beta,
                               4 b_val, 5 b_gate, 6 b_out (broadcast)
    wfc_ref : (Hp, Hp)   bf16  fc weight, (in, out) layout, zero padded
    wz_ref  : (Hp, 2Hp)  bf16  gated_residual rows acting on z,     [val|gate] cols
    wt_ref  : (Hp, 2Hp)  bf16  gated_residual rows acting on tuple, [val|gate] cols
    wout_ref: (1, Hp)    bf16  fc_out weight row (zero padded)
    o_ref   : (1, TM)    f32   lane-dense output row for this batch tile
    """
    x = x_ref[...]                                   # (TM, Hp) bf16
    mask   = vec_ref[0:1, :]                         # (1, Hp) f32
    b_fc   = vec_ref[1:2, :]
    gamma  = vec_ref[2:3, :]
    beta   = vec_ref[3:4, :]
    b_val  = vec_ref[4:5, :]
    b_gate = vec_ref[5:6, :]
    b_out  = vec_ref[6:7, 0:1]                       # (1, 1)

    # fc + LayerNorm + ReLU (dropout = identity in eval mode). Padded lanes of
    # h are already exactly zero (zero-padded wfc columns and b_fc), so no
    # mask multiply is needed before the mean.
    h = jnp.dot(x, wfc_ref[...], preferred_element_type=jnp.float32) + b_fc
    mean = jnp.sum(h, axis=-1, keepdims=True) * inv_h        # divide by real H
    d = (h - mean) * mask
    var = jnp.sum(d * d, axis=-1, keepdims=True) * inv_h     # centered form
    z = jnp.maximum(d * jax.lax.rsqrt(var + 1e-5) * gamma + beta, 0.0)
    zb = z.astype(x.dtype)                                   # bf16 for the MXU

    # gated_residual_proj(cat(z, tuple_emb)): two K=Hp, N=2Hp matmuls with
    # [value|gate] columns fused; the split is a free 128-lane-aligned slice.
    vg = (jnp.dot(zb, wz_ref[...], preferred_element_type=jnp.float32)
          + jnp.dot(x, wt_ref[...], preferred_element_type=jnp.float32))
    value = vg[:, :hp] + b_val
    gate = vg[:, hp:] + b_gate
    residual = (value * jax.nn.sigmoid(gate)).astype(x.dtype)   # bf16

    # fc_out as bf16 (1,Hp) . (TM,Hp)^T -> lane-dense (1, TM) output row.
    out_row = jax.lax.dot_general(
        wout_ref[...], residual,
        dimension_numbers=(((1,), (1,)), ((), ())),
        preferred_element_type=jnp.float32)
    o_ref[...] = out_row + b_out


def _cdiv(a, m):
    return (a + m - 1) // m


def _round_up(a, m):
    return _cdiv(a, m) * m


def make_params(key, num_entities, num_data_properties, embedding_dim):
    H = embedding_dim * 2
    ks = jax.random.split(key, 8)
    s = 0.1

    def rnd(k, shape):
        return s * jax.random.normal(k, shape, jnp.float32)

    return {
        "entity_emb": rnd(ks[0], (num_entities, embedding_dim)),
        "attr_emb":   rnd(ks[1], (num_data_properties, embedding_dim)),
        # nn.Linear weights stored as (in, out) == PyTorch weight.T
        "w_fc":  rnd(ks[2], (H, H)),
        "b_fc":  rnd(ks[3], (1, H)),
        "gamma": jnp.ones((1, H), jnp.float32),
        "beta":  jnp.zeros((1, H), jnp.float32),
        # gated_residual_proj (2H -> 2H), (in, out) layout:
        # rows 0:H act on z, rows H:2H act on tuple_emb; cols 0:H value, H:2H gate.
        "w_grp": rnd(ks[4], (2 * H, 2 * H)),
        "b_grp": rnd(ks[5], (1, 2 * H)),
        # fc_out: PyTorch weight shape (1, H), used as a row.
        "w_out": rnd(ks[6], (1, H)),
        "b_out": rnd(ks[7], (1, 1)),
    }


def literal_embeddings_forward(entity_idx, attr_idx, params, *, block_batch=512):
    # Embedding lookups + concat left to XLA (tables are tiny here); cast to
    # bf16 right after the gathers so XLA fuses the cast and we never write an
    # f32 activation copy to HBM.
    e_emb = params["entity_emb"][entity_idx].astype(jnp.bfloat16)
    a_emb = params["attr_emb"][attr_idx].astype(jnp.bfloat16)
    tuple_emb = jnp.concatenate([e_emb, a_emb], axis=1)       # (B, H) bf16
    B, H = tuple_emb.shape
    Hp = _round_up(H, 128)                                    # lane-align hidden

    # Batch tile: multiple of 128 (lane-dense output stores, full MXU rows),
    # capped by block_batch; prefer >= 2 tiles once B exceeds one tile so both
    # v7x TensorCores get work under the "parallel" grid axis.
    TM = max(128, min(_round_up(block_batch, 128), _round_up(B, 128)))
    if B > 128 and _cdiv(B, TM) < 2:
        TM = _round_up(_cdiv(B, 2), 128)
    Bp = _round_up(B, TM)
    num_tiles = Bp // TM

    # Only materialize a padded copy when padding is actually required.
    if Bp != B or Hp != H:
        x = jnp.zeros((Bp, Hp), jnp.bfloat16).at[:B, :H].set(tuple_emb)
    else:
        x = tuple_emb

    # Padded, VMEM-resident weights (zero pads are provably inert everywhere).
    wfc = jnp.zeros((Hp, Hp), jnp.bfloat16).at[:H, :H].set(
        params["w_fc"].astype(jnp.bfloat16))
    w_grp = params["w_grp"].astype(jnp.bfloat16)
    wz = (jnp.zeros((Hp, 2 * Hp), jnp.bfloat16)
          .at[:H, :H].set(w_grp[:H, :H])            # z -> value
          .at[:H, Hp:Hp + H].set(w_grp[:H, H:]))    # z -> gate
    wt = (jnp.zeros((Hp, 2 * Hp), jnp.bfloat16)
          .at[:H, :H].set(w_grp[H:, :H])            # tuple -> value
          .at[:H, Hp:Hp + H].set(w_grp[H:, H:]))    # tuple -> gate
    wout = jnp.zeros((1, Hp), jnp.bfloat16).at[:, :H].set(
        params["w_out"].astype(jnp.bfloat16))

    # Stack all small f32 row-operands into one (8, Hp) resident input.
    vec = (jnp.zeros((8, Hp), jnp.float32)
           .at[0, :H].set(1.0)                          # lane mask (real lanes)
           .at[1, :H].set(params["b_fc"][0])
           .at[2, :H].set(params["gamma"][0])
           .at[3, :H].set(params["beta"][0])
           .at[4, :H].set(params["b_grp"][0, :H])       # value bias
           .at[5, :H].set(params["b_grp"][0, H:])       # gate bias
           .at[6, :].set(params["b_out"][0, 0]))        # fc_out bias

    weights = (vec, wfc, wz, wt, wout)

    def resident(a):
        # Full-array block + constant index_map -> loaded once, VMEM-resident.
        return pl.BlockSpec(a.shape, lambda i, _n=a.ndim: (0,) * _n)

    out = pl.pallas_call(
        functools.partial(literal_kernel, inv_h=1.0 / H, hp=Hp),
        out_shape=jax.ShapeDtypeStruct((1, Bp), jnp.float32),
        grid=(num_tiles,),
        in_specs=[pl.BlockSpec((TM, Hp), lambda i: (i, 0))]
                 + [resident(a) for a in weights],
        out_specs=pl.BlockSpec((1, TM), lambda i: (0, i)),
        compiler_params=pltpu.CompilerParams(
            dimension_semantics=("parallel",),
            vmem_limit_bytes=64 * 1024 * 1024),
    )(x, *weights)

    return out[0, :B]                                   # .flatten() -> (B,)


def reference_forward(entity_idx, attr_idx, params):
    """Pure-JAX replica of the PyTorch forward (eval mode), mirroring the
    kernel's mixed-precision policy (bf16 MXU inputs, f32 everywhere else).
    Note: validates the kernel vs. this bf16 policy, not vs. true fp32."""
    e = params["entity_emb"][entity_idx]
    a = params["attr_emb"][attr_idx]
    t = jnp.concatenate([e, a], axis=1)
    H = t.shape[-1]

    tb = t.astype(jnp.bfloat16)
    h = jnp.dot(tb, params["w_fc"].astype(jnp.bfloat16),
                preferred_element_type=jnp.float32) + params["b_fc"]
    mean = h.mean(-1, keepdims=True)
    var = ((h - mean) ** 2).mean(-1, keepdims=True)
    hn = (h - mean) * jax.lax.rsqrt(var + 1e-5)
    z = jax.nn.relu(hn * params["gamma"] + params["beta"])

    zt = jnp.concatenate([z, t], axis=1).astype(jnp.bfloat16)
    x_proj = jnp.dot(zt, params["w_grp"].astype(jnp.bfloat16),
                     preferred_element_type=jnp.float32) + params["b_grp"]
    value, gate = x_proj[:, :H], x_proj[:, H:]
    residual = value * jax.nn.sigmoid(gate)
    out = jnp.dot(residual.astype(jnp.bfloat16),
                  params["w_out"].astype(jnp.bfloat16).T,
                  preferred_element_type=jnp.float32) + params["b_out"]
    return out.reshape(-1)


if __name__ == "__main__":
    embedding_dim = 32          # hidden_dim H = 64 -> padded to Hp = 128 lanes
    num_entities = 16
    num_data_properties = 5
    batch = 8

    key = jax.random.PRNGKey(0)
    kp, ke, ka = jax.random.split(key, 3)
    params = make_params(kp, num_entities, num_data_properties, embedding_dim)
    entity_idx = jax.random.randint(ke, (batch,), 0, num_entities)
    attr_idx = jax.random.randint(ka, (batch,), 0, num_data_properties)

    out = literal_embeddings_forward(entity_idx, attr_idx, params)
    out = jax.block_until_ready(out)

    ref = reference_forward(entity_idx, attr_idx, params)
    assert out.shape == (batch,)
    assert jnp.allclose(out, ref, atol=1e-3, rtol=1e-3), (out, ref)
    print("KERNEL_OK")
</pallas_src>

<mosaic_0001>
module attributes {stable_mosaic.version = 11 : i64} {
  func.func @literal_kernel(%arg0: i32, %arg1: memref<128x128xbf16, #tpu.memory_space<vmem>>, %arg2: memref<8x128xf32, #tpu.memory_space<vmem>>, %arg3: memref<128x128xbf16, #tpu.memory_space<vmem>>, %arg4: memref<128x256xbf16, #tpu.memory_space<vmem>>, %arg5: memref<128x256xbf16, #tpu.memory_space<vmem>>, %arg6: memref<1x128xbf16, #tpu.memory_space<vmem>>, %arg7: memref<1x128xf32, #tpu.memory_space<vmem>>) attributes {dimension_semantics = [#tpu.dimension_semantics<parallel>], iteration_bounds = array<i64: 1>, scalar_prefetch = 0 : i64, scratch_operands = 0 : i64, tpu.core_type = #tpu.core_type<tc>, window_params = [{transform_indices = @transform_0, window_bounds = array<i64: 128, 128>}, {pipeline_mode = #tpu.pipeline_mode<synchronous>, transform_indices = @transform_1, window_bounds = array<i64: 8, 128>}, {pipeline_mode = #tpu.pipeline_mode<synchronous>, transform_indices = @transform_2, window_bounds = array<i64: 128, 128>}, {pipeline_mode = #tpu.pipeline_mode<synchronous>, transform_indices = @transform_3, window_bounds = array<i64: 128, 256>}, {pipeline_mode = #tpu.pipeline_mode<synchronous>, transform_indices = @transform_4, window_bounds = array<i64: 128, 256>}, {pipeline_mode = #tpu.pipeline_mode<synchronous>, transform_indices = @transform_5, window_bounds = array<i64: 1, 128>}, {transform_indices = @transform_6, window_bounds = array<i64: 1, 128>}]} {
    %c0 = arith.constant 0 : index
    %c0_0 = arith.constant 0 : index
    %0 = vector.load %arg1[%c0, %c0_0] : memref<128x128xbf16, #tpu.memory_space<vmem>>, vector<128x128xbf16>
    %c0_1 = arith.constant 0 : index
    %c0_2 = arith.constant 0 : index
    %1 = vector.load %arg2[%c0_1, %c0_2] : memref<8x128xf32, #tpu.memory_space<vmem>>, vector<1x128xf32>
    %c1 = arith.constant 1 : index
    %c0_3 = arith.constant 0 : index
    %2 = vector.load %arg2[%c1, %c0_3] : memref<8x128xf32, #tpu.memory_space<vmem>>, vector<1x128xf32>
    %c2 = arith.constant 2 : index
    %c0_4 = arith.constant 0 : index
    %3 = vector.load %arg2[%c2, %c0_4] : memref<8x128xf32, #tpu.memory_space<vmem>>, vector<1x128xf32>
    %c3 = arith.constant 3 : index
    %c0_5 = arith.constant 0 : index
    %4 = vector.load %arg2[%c3, %c0_5] : memref<8x128xf32, #tpu.memory_space<vmem>>, vector<1x128xf32>
    %c4 = arith.constant 4 : index
    %c0_6 = arith.constant 0 : index
    %5 = vector.load %arg2[%c4, %c0_6] : memref<8x128xf32, #tpu.memory_space<vmem>>, vector<1x128xf32>
    %c5 = arith.constant 5 : index
    %c0_7 = arith.constant 0 : index
    %6 = vector.load %arg2[%c5, %c0_7] : memref<8x128xf32, #tpu.memory_space<vmem>>, vector<1x128xf32>
    %c6 = arith.constant 6 : index
    %c0_8 = arith.constant 0 : index
    %7 = vector.load %arg2[%c6, %c0_8] : memref<8x128xf32, #tpu.memory_space<vmem>>, vector<1x1xf32>
    %c0_9 = arith.constant 0 : index
    %c0_10 = arith.constant 0 : index
    %8 = vector.load %arg3[%c0_9, %c0_10] : memref<128x128xbf16, #tpu.memory_space<vmem>>, vector<128x128xbf16>
    %cst = arith.constant dense<0.000000e+00> : vector<128x128xf32>
    %9 = tpu.matmul %0, %8, %cst {dimension_numbers = #tpu.dot_dimension_numbers<[1], [0], [0], [1], [0, 0, 1, 1], [], []>} : vector<128x128xbf16>, vector<128x128xbf16>, vector<128x128xf32> -> vector<128x128xf32>
    %10 = vector.broadcast %2 : vector<1x128xf32> to vector<128x128xf32>
    %11 = arith.addf %9, %10 : vector<128x128xf32>
    %cst_11 = arith.constant dense<0.000000e+00> : vector<128xf32>
    %12 = vector.multi_reduction <add>, %11, %cst_11 [1] : vector<128x128xf32> to vector<128xf32>
    %13 = vector.shape_cast %12 : vector<128xf32> to vector<128x1xf32>
    %cst_12 = arith.constant 1.562500e-02 : f32
    %14 = vector.broadcast %cst_12 : f32 to vector<128x1xf32>
    %15 = arith.mulf %13, %14 : vector<128x1xf32>
    %16 = vector.broadcast %15 : vector<128x1xf32> to vector<128x128xf32>
    %17 = arith.subf %11, %16 : vector<128x128xf32>
    %18 = vector.broadcast %1 : vector<1x128xf32> to vector<128x128xf32>
    %19 = arith.mulf %17, %18 : vector<128x128xf32>
    %20 = arith.mulf %19, %19 : vector<128x128xf32>
    %cst_13 = arith.constant dense<0.000000e+00> : vector<128xf32>
    %21 = vector.multi_reduction <add>, %20, %cst_13 [1] : vector<128x128xf32> to vector<128xf32>
    %22 = vector.shape_cast %21 : vector<128xf32> to vector<128x1xf32>
    %cst_14 = arith.constant 1.562500e-02 : f32
    %23 = vector.broadcast %cst_14 : f32 to vector<128x1xf32>
    %24 = arith.mulf %22, %23 : vector<128x1xf32>
    %cst_15 = arith.constant 9.99999974E-6 : f32
    %25 = vector.broadcast %cst_15 : f32 to vector<128x1xf32>
    %26 = arith.addf %24, %25 : vector<128x1xf32>
    %27 = math.rsqrt %26 : vector<128x1xf32>
    %28 = vector.broadcast %27 : vector<128x1xf32> to vector<128x128xf32>
    %29 = arith.mulf %19, %28 : vector<128x128xf32>
    %30 = vector.broadcast %3 : vector<1x128xf32> to vector<128x128xf32>
    %31 = arith.mulf %29, %30 : vector<128x128xf32>
    %32 = vector.broadcast %4 : vector<1x128xf32> to vector<128x128xf32>
    %33 = arith.addf %31, %32 : vector<128x128xf32>
    %cst_16 = arith.constant 0.000000e+00 : f32
    %34 = vector.broadcast %cst_16 : f32 to vector<128x128xf32>
    %35 = arith.maximumf %33, %34 : vector<128x128xf32>
    %36 = arith.truncf %35 : vector<128x128xf32> to vector<128x128xbf16>
    %c0_17 = arith.constant 0 : index
    %c0_18 = arith.constant 0 : index
    %37 = vector.load %arg4[%c0_17, %c0_18] : memref<128x256xbf16, #tpu.memory_space<vmem>>, vector<128x256xbf16>
    %cst_19 = arith.constant dense<0.000000e+00> : vector<128x256xf32>
    %38 = tpu.matmul %36, %37, %cst_19 {dimension_numbers = #tpu.dot_dimension_numbers<[1], [0], [0], [1], [0, 0, 1, 1], [], []>} : vector<128x128xbf16>, vector<128x256xbf16>, vector<128x256xf32> -> vector<128x256xf32>
    %c0_20 = arith.constant 0 : index
    %c0_21 = arith.constant 0 : index
    %39 = vector.load %arg5[%c0_20, %c0_21] : memref<128x256xbf16, #tpu.memory_space<vmem>>, vector<128x256xbf16>
    %cst_22 = arith.constant dense<0.000000e+00> : vector<128x256xf32>
    %40 = tpu.matmul %0, %39, %cst_22 {dimension_numbers = #tpu.dot_dimension_numbers<[1], [0], [0], [1], [0, 0, 1, 1], [], []>} : vector<128x128xbf16>, vector<128x256xbf16>, vector<128x256xf32> -> vector<128x256xf32>
    %41 = arith.addf %38, %40 : vector<128x256xf32>
    %42 = vector.extract_strided_slice %41 {offsets = [0, 0], sizes = [128, 128], strides = [1, 1]} : vector<128x256xf32> to vector<128x128xf32>
    %43 = vector.broadcast %5 : vector<1x128xf32> to vector<128x128xf32>
    %44 = arith.addf %42, %43 : vector<128x128xf32>
    %45 = vector.extract_strided_slice %41 {offsets = [0, 128], sizes = [128, 128], strides = [1, 1]} : vector<128x256xf32> to vector<128x128xf32>
    %46 = vector.broadcast %6 : vector<1x128xf32> to vector<128x128xf32>
    %47 = arith.addf %45, %46 : vector<128x128xf32>
    %48 = arith.negf %47 : vector<128x128xf32>
    %49 = math.exp %48 : vector<128x128xf32>
    %cst_23 = arith.constant 1.000000e+00 : f32
    %50 = vector.broadcast %cst_23 : f32 to vector<128x128xf32>
    %51 = arith.addf %50, %49 : vector<128x128xf32>
    %52 = arith.divf %50, %51 : vector<128x128xf32>
    %53 = arith.mulf %44, %52 : vector<128x128xf32>
    %54 = arith.truncf %53 : vector<128x128xf32> to vector<128x128xbf16>
    %c0_24 = arith.constant 0 : index
    %c0_25 = arith.constant 0 : index
    %55 = vector.load %arg6[%c0_24, %c0_25] : memref<1x128xbf16, #tpu.memory_space<vmem>>, vector<1x128xbf16>
    %cst_26 = arith.constant dense<0.000000e+00> : vector<1x128xf32>
    %56 = tpu.matmul %55, %54, %cst_26 {dimension_numbers = #tpu.dot_dimension_numbers<[1], [1], [0], [0], [0, 0, 1, 0], [], []>} : vector<1x128xbf16>, vector<128x128xbf16>, vector<1x128xf32> -> vector<1x128xf32>
    %57 = vector.broadcast %7 : vector<1x1xf32> to vector<1x128xf32>
    %58 = arith.addf %56, %57 : vector<1x128xf32>
    %c0_27 = arith.constant 0 : index
    %c0_28 = arith.constant 0 : index
    %59 = vector.load %arg7[%c0_27, %c0_28] : memref<1x128xf32, #tpu.memory_space<vmem>>, vector<1x128xf32>
    tpu.vector_store %arg7[%c0_27, %c0_28], %58 {strides = array<i32>} : memref<1x128xf32, #tpu.memory_space<vmem>>, vector<1x128xf32>,
    return
  }
  func.func @transform_0(%arg0: i32) -> (i32, i32) {
    %c0_i32 = arith.constant 0 : i32
    %c0_i32_0 = arith.constant 0 : i32
    return %arg0, %c0_i32 : i32, i32
  }
  func.func @transform_1(%arg0: i32) -> (i32, i32) {
    %c0_i32 = arith.constant 0 : i32
    %c0_i32_0 = arith.constant 0 : i32
    %c0_i32_1 = arith.constant 0 : i32
    return %c0_i32, %c0_i32_0 : i32, i32
  }
  func.func @transform_2(%arg0: i32) -> (i32, i32) {
    %c0_i32 = arith.constant 0 : i32
    %c0_i32_0 = arith.constant 0 : i32
    %c0_i32_1 = arith.constant 0 : i32
    return %c0_i32, %c0_i32_0 : i32, i32
  }
  func.func @transform_3(%arg0: i32) -> (i32, i32) {
    %c0_i32 = arith.constant 0 : i32
    %c0_i32_0 = arith.constant 0 : i32
    %c0_i32_1 = arith.constant 0 : i32
    return %c0_i32, %c0_i32_0 : i32, i32
  }
  func.func @transform_4(%arg0: i32) -> (i32, i32) {
    %c0_i32 = arith.constant 0 : i32
    %c0_i32_0 = arith.constant 0 : i32
    %c0_i32_1 = arith.constant 0 : i32
    return %c0_i32, %c0_i32_0 : i32, i32
  }
  func.func @transform_5(%arg0: i32) -> (i32, i32) {
    %c0_i32 = arith.constant 0 : i32
    %c0_i32_0 = arith.constant 0 : i32
    %c0_i32_1 = arith.constant 0 : i32
    return %c0_i32, %c0_i32_0 : i32, i32
  }
  func.func @transform_6(%arg0: i32) -> (i32, i32) {
    %c0_i32 = arith.constant 0 : i32
    %c0_i32_0 = arith.constant 0 : i32
    return %c0_i32, %arg0 : i32, i32
  }
}

</mosaic_0001>

<bundles_post_ra>
// kernel: tpu_custom_call.1
= control target key start
LH: loop header
LB: loop body
LE: loop exit
PB: predicated region body
PF: predicated region fallthrough
CT: control target
= control target key end

     0   :  { %11 = vsyncpa [#allocation3], 0  ;;  %s2306_s0 = inlined_call_operand.hbm [shape: bf16[128,128], index: 0, kind: input, shape index: {}]   ;;  %s2307_s1 = inlined_call_operand.hbm [shape: f32[8,128], index: 1, kind: input, shape index: {}]   ;;  %s2308_s2 = inlined_call_operand.hbm [shape: bf16[128,128], index: 2, kind: input, shape index: {}]   ;;  %s2309_s3 = inlined_call_operand.hbm [shape: bf16[128,256], index: 3, kind: input, shape index: {}]   ;;  %s2310_s4 = inlined_call_operand.hbm [shape: bf16[128,256], index: 4, kind: input, shape index: {}]   ;;  %s2311_s5 = inlined_call_operand.hbm [shape: bf16[1,128], index: 5, kind: input, shape index: {}]   ;;  %s2312_s6 = inlined_call_operand.hbm [shape: f32[1,128], index: 6, kind: output, shape index: {}]  }
   0x1   :  { %12 = vsyncpa [#allocation6], 0 }
   0x2   :  { %13 = vsyncpa [#allocation9], 0 }
   0x3   :  { %14 = vsyncpa [#allocation12], 0 }
   0x4   :  { %15 = vsyncpa [#allocation4], 0  ;;  %s1760_s21 = smov [#allocation5]   ;;  %s1761_s23 = smov [#allocation8]  }
   0x5   :  { %s34_s22 = sshll.u32 %s1760_s21, 4  ;;  %s55_s24 = sshll.u32 %s1761_s23, 4  ;;  %s35_s22 = int_to_ptr.vmem [resolvable:$true] %s34_s22  ;;  %s1809_s24 = int_to_ptr.vmem [resolvable:$true] %s55_s24 }
   0x6   :  { %s1596_s27 = scalar_lea.hbm %s2307_s1, 128 }
   0x7   :  { %p1597_p0 = scmp.ne.s32.totalorder %s2307_s1, %s1596_s27  ;;  %p1600_p1 = scmp.lt.u32.totalorder %s1596_s27, %s2307_s1 }
   0x9   :  { %p1602_p2 = pnand %p1600_p1, %p1597_p0 }
   0xb   :  { %1605 = shalt.err (!%p1602_p2)
}
   0xc   :  { %s1606_s8 = scalar_lea.vmem %s35_s22, 128  ;;  %p1611_p4 = scmp.lt.s32.totalorder %s35_s22, %s35_s22 }
   0xd   :  { %p1607_p3 = scmp.ne.s32.totalorder %s35_s22, %s1606_s8  ;;  %p1612_p5 = scmp.lt.s32.totalorder %s1606_s8, %s1606_s8 }
   0xf   :  { %p1613_p6 = por %p1612_p5, %p1611_p4 }
  0x11   :  { %p1614_p7 = pnand %p1613_p6, %p1607_p3 }
  0x13   :  { %1617 = shalt.err (!%p1614_p7)
}
  0x14   :  { %37 = dma.hbm_to_vmem [thread:$0]  %s2307_s1, 128, %s35_s22, [#allocation6]  }
  0x15   :  { %s1618_s13 = scalar_lea.hbm %s2309_s3, 2048 }
  0x16   :  { %p1619_p8 = scmp.ne.s32.totalorder %s2309_s3, %s1618_s13  ;;  %p1622_p9 = scmp.lt.u32.totalorder %s1618_s13, %s2309_s3 }
  0x18   :  { %p1624_p10 = pnand %p1622_p9, %p1619_p8 }
  0x1a   :  { %1627 = shalt.err (!%p1624_p10)
}
  0x1b   :  { %s1628_s18 = scalar_lea.vmem %s1809_s24, 2048  ;;  %p1633_p12 = scmp.lt.s32.totalorder %s1809_s24, %s1809_s24 }
  0x1c   :  { %p1629_p11 = scmp.ne.s32.totalorder %s1809_s24, %s1628_s18  ;;  %p1634_p13 = scmp.lt.s32.totalorder %s1628_s18, %s1628_s18 }
  0x1e   :  { %p1635_p0 = por %p1634_p13, %p1633_p12 }
  0x20   :  { %p1636_p1 = pnand %p1635_p0, %p1629_p11 }
  0x22   :  { %1639 = shalt.err (!%p1636_p1)
}
  0x23   :  { %s1762_s1 = smov 128   ;;  %s1763_s19 = smov 8  }
  0x24   :  { %61 = dma.hbm_to_vmem [thread:$0]  %s2309_s3, 2048, %s1809_s24, [#allocation9], %s1762_s1, %s1762_s1, %s1763_s19  }
  0x25   :  { %s1764_s22 = smov [#allocation2]   ;;  %s1640_s27 = scalar_lea.hbm %s2306_s0, 1024 }
  0x26   :  { %s21_s23 = sshll.u32 %s1764_s22, 4  ;;  %p1641_p2 = scmp.ne.s32.totalorder %s2306_s0, %s1640_s27  ;;  %s22_s23 = int_to_ptr.vmem [resolvable:$true] %s21_s23 }
  0x27   :  { %p1644_p3 = scmp.lt.u32.totalorder %s1640_s27, %s2306_s0 }
  0x29   :  { %p1646_p4 = pnand %p1644_p3, %p1641_p2 }
  0x2b   :  { %1649 = shalt.err (!%p1646_p4)
}
  0x2c   :  { %s1650_s8 = scalar_lea.vmem %s22_s23, 1024  ;;  %p1655_p6 = scmp.lt.s32.totalorder %s22_s23, %s22_s23 }
  0x2d   :  { %p1651_p5 = scmp.ne.s32.totalorder %s22_s23, %s1650_s8  ;;  %p1656_p7 = scmp.lt.s32.totalorder %s1650_s8, %s1650_s8 }
  0x2f   :  { %p1657_p8 = por %p1656_p7, %p1655_p6 }
  0x31   :  { %p1658_p9 = pnand %p1657_p8, %p1651_p5 }
  0x33   :  { %1661 = shalt.err (!%p1658_p9)
}
  0x34   :  { %s1765_s3 = smov 64   ;;  %s1766_s24 = smov 4  }
  0x35   :  { %27 = dma.hbm_to_vmem [thread:$0]  %s2306_s0, 1024, %s22_s23, [#allocation3], %s1765_s3, %s1765_s3, %s1766_s24  }
  0x36   :  { %s1767_s11 = smov [#allocation7]   ;;  %s1768_s13 = smov [#allocation10]  }
  0x37   :  { %s43_s12 = sshll.u32 %s1767_s11, 4  ;;  %s67_s14 = sshll.u32 %s1768_s13, 4  ;;  %s44_s12 = int_to_ptr.vmem [resolvable:$true] %s43_s12  ;;  %s68_s14 = int_to_ptr.vmem [resolvable:$true] %s67_s14 }
  0x38   :  { %s1662_s17 = scalar_lea.hbm %s2308_s2, 1024 }
  0x39   :  { %p1663_p10 = scmp.ne.s32.totalorder %s2308_s2, %s1662_s17  ;;  %p1666_p11 = scmp.lt.u32.totalorder %s1662_s17, %s2308_s2 }
  0x3b   :  { %p1668_p12 = pnand %p1666_p11, %p1663_p10 }
  0x3d   :  { %1671 = shalt.err (!%p1668_p12)
}
  0x3e   :  { %s1672_s0 = scalar_lea.vmem %s44_s12, 1024  ;;  %p1677_p0 = scmp.lt.s32.totalorder %s44_s12, %s44_s12 }
  0x3f   :  { %p1673_p13 = scmp.ne.s32.totalorder %s44_s12, %s1672_s0  ;;  %p1678_p1 = scmp.lt.s32.totalorder %s1672_s0, %s1672_s0 }
  0x41   :  { %p1679_p2 = por %p1678_p1, %p1677_p0 }
  0x43   :  { %p1680_p3 = pnand %p1679_p2, %p1673_p13 }
  0x45   :  { %1683 = shalt.err (!%p1680_p3)
}
  0x46   :  { %49 = dma.hbm_to_vmem [thread:$0]  %s2308_s2, 1024, %s44_s12, [#allocation6], %s1765_s3, %s1765_s3, %s1766_s24  }
  0x47   :  { %s1684_s28 = scalar_lea.hbm %s2310_s4, 2048 }
  0x48   :  { %p1685_p4 = scmp.ne.s32.totalorder %s2310_s4, %s1684_s28  ;;  %p1688_p5 = scmp.lt.u32.totalorder %s1684_s28, %s2310_s4 }
  0x4a   :  { %p1690_p6 = pnand %p1688_p5, %p1685_p4 }
  0x4c   :  { %1693 = shalt.err (!%p1690_p6)
}
  0x4d   :  { %s1694_s9 = scalar_lea.vmem %s68_s14, 2048  ;;  %p1699_p8 = scmp.lt.s32.totalorder %s68_s14, %s68_s14 }
  0x4e   :  { %p1695_p7 = scmp.ne.s32.totalorder %s68_s14, %s1694_s9  ;;  %p1700_p9 = scmp.lt.s32.totalorder %s1694_s9, %s1694_s9 }
  0x50   :  { %p1701_p10 = por %p1700_p9, %p1699_p8 }
  0x52   :  { %p1702_p11 = pnand %p1701_p10, %p1695_p7 }
  0x54   :  { %1705 = shalt.err (!%p1702_p11)
}
  0x55   :  { %73 = dma.hbm_to_vmem [thread:$0]  %s2310_s4, 2048, %s68_s14, [#allocation9], %s1762_s1, %s1762_s1, %s1763_s19  }
  0x56   :  { %s1769_s24 = smov [#allocation11]   ;;  %s1706_s13 = scalar_lea.hbm %s2311_s5, 16 }
  0x57   :  { %s80_s10 = sshll.u32 %s1769_s24, 4  ;;  %p1707_p12 = scmp.ne.s32.totalorder %s2311_s5, %s1706_s13  ;;  %s81_s10 = int_to_ptr.vmem [resolvable:$true] %s80_s10 }
  0x58   :  { %p1710_p13 = scmp.lt.u32.totalorder %s1706_s13, %s2311_s5 }
  0x5a   :  { %p1712_p0 = pnand %p1710_p13, %p1707_p12 }
  0x5c   :  { %1715 = shalt.err (!%p1712_p0)
}
  0x5d   :  { %s1716_s20 = scalar_lea.vmem %s81_s10, 16  ;;  %s1720_s4 = scalar_lea.vmem %s81_s10, 32 }
  0x5e   :  { %p1717_p1 = scmp.ne.s32.totalorder %s81_s10, %s1716_s20  ;;  %p1721_p2 = scmp.lt.s32.totalorder %s81_s10, %s81_s10 }
  0x5f   :  { %p1722_p3 = scmp.lt.s32.totalorder %s1720_s4, %s1716_s20 }
  0x61   :  { %p1723_p4 = por %p1722_p3, %p1721_p2 }
  0x63   :  { %p1724_p5 = pnand %p1723_p4, %p1717_p1 }
  0x65   :  { %1727 = shalt.err (!%p1724_p5)
}
  0x66   :  { %83 = dma.hbm_to_vmem [thread:$0]  %s2311_s5, 16, %s81_s10, [#allocation12]  }
  0x67   :  { %1750 = dma.done.wait [#allocation3], 1024  }
  0x68   :  { %1751 = vsyncadd [#allocation3], 4294966272 }
  0x69   :  { %1752 = dma.done.wait [#allocation6], 1152  }
  0x6a   :  { %1753 = vsyncadd [#allocation6], 4294966144 }
  0x6b   :  { %1754 = dma.done.wait [#allocation9], 4096  }
  0x6c   :  { %1755 = vsyncadd [#allocation9], 4294963200 }
  0x6d   :  { %1756 = dma.done.wait [#allocation12], 16  }
  0x6e   :  { %1757 = vsyncadd [#allocation12], 4294967280  ;;  %v1436_v0 = vld [vmem:[#allocation7] sm:$0xff]   ;;  %v1437_v1 = vld [vmem:[#allocation7 + $0x8] sm:$0xff]   ;;  %vm1772_vm0 = vmmov 0   ;;  %s1773_s5 = smov [#allocation13]  }
  0x6f   :  { %1337 = vmatprep.subr.bf16.mxu1 %v1436_v0  ;;  %v1438_v2 = vld [vmem:[#allocation7 + $0x10] sm:$0xff]   ;;  %v1439_v3 = vld [vmem:[#allocation7 + $0x18] sm:$0xff]   ;;  %v1440_v5 = vld [vmem:[#allocation7 + $0x20] sm:$0xff]   ;;  %s1230_s14 = sshll.u32 %s1773_s5, 4  ;;  %s1231_s14 = int_to_ptr.vmem [resolvable:$true] %s1230_s14 }
  0x70   :  { %1338 = vmatpush3.bf16.msra.mxu1 %v1436_v0  ;;  %v1894_v4 = vld [vmem:[#allocation2] sm:$0xff]   ;;  %v1441_v6 = vld [vmem:[#allocation7 + $0x28] sm:$0xff]   ;;  %v1442_v7 = vld [vmem:[#allocation7 + $0x30] sm:$0xff]   ;;  %s1728_s21 = scalar_lea.vmem %s1231_s14, 16  ;;  %s1732_s22 = scalar_lea.vmem %s1231_s14, 32 }
  0x71   :  { %1339 = vmatprep.subr.bf16.mxu1 %v1437_v1  ;;  %1353 = vmatprep.mubr.bf16.mxu1 %v1894_v4  ;;  %v1443_v8 = vld [vmem:[#allocation7 + $0x38] sm:$0xff]   ;;  %v1897_v9 = vld [vmem:[#allocation2 + $0x8] sm:$0xff]   ;;  %v1899_v10 = vld [vmem:[#allocation2 + $0x10] sm:$0xff]   ;;  %p1729_p6 = scmp.ne.s32.totalorder %s1231_s14, %s1728_s21  ;;  %p1733_p7 = scmp.lt.s32.totalorder %s1231_s14, %s1231_s14 }
  0x72   :  { %v1903_v11 = vld [vmem:[#allocation2 + $0x18] sm:$0xff]   ;;  %v1905_v12 = vld [vmem:[#allocation2 + $0x20] sm:$0xff]   ;;  %v1909_v13 = vld [vmem:[#allocation2 + $0x28] sm:$0xff]   ;;  %p1734_p8 = scmp.lt.s32.totalorder %s1732_s22, %s1728_s21 }
  0x73   :  { %v1911_v14 = vld [vmem:[#allocation2 + $0x30] sm:$0xff]   ;;  %v1915_v15 = vld [vmem:[#allocation2 + $0x38] sm:$0xff]   ;;  %v1242_v16 = vld [vmem:[#allocation5 + $0x1] ss:$0 sm:$0xff] }
  0x74   :  { %1340 = vmatpush3.bf16.msra.mxu1 %v1437_v1  ;;  %v1452_v49 = vld [vmem:[#allocation10 + $0x4] ss:$8 sps:$4 sm:$0xff]   ;;  %v1454_v50 = vld [vmem:[#allocation10] ss:$8 sps:$4 sm:$0xff]   ;;  %v1458_v53 = vld [vmem:[#allocation10 + $0x14] ss:$8 sps:$4 sm:$0xff]   ;;  %p1735_p9 = por %p1734_p8, %p1733_p7 }
  0x75   :  { %1341 = vmatprep.subr.bf16.mxu1 %v1438_v2  ;;  %v1455_v51 = vld [vmem:[#allocation8] ss:$8 sps:$4 sm:$0xff]   ;;  %v1457_v52 = vld [vmem:[#allocation8 + $0x4] ss:$8 sps:$4 sm:$0xff]   ;;  %711 = vmatprep.subr.bf16.mxu0 %v1452_v49  ;;  %v1460_v54 = vld [vmem:[#allocation10 + $0x10] ss:$8 sps:$4 sm:$0xff]  }
  0x76   :  { %712 = vmatpush1.bf16.msra.mxu0 %v1454_v50  ;;  %v1966_v59 = vld [vmem:[#allocation5] ss:$0 sm:$0xff]  ;;  %p1736_p10 = pnand %p1735_p9, %p1729_p6 }
  0x77   :  { %713 = vmatprep.subr.bf16.mxu0 %v1458_v53 }
  0x78   :  { %1342 = vmatpush3.bf16.msra.mxu1 %v1438_v2 }
  0x79   :  { %1343 = vmatprep.subr.bf16.mxu1 %v1439_v3 }
  0x7a   :  { %714 = vmatpush1.bf16.msra.mxu0 %v1460_v54 }
  0x7c   :  { %1344 = vmatpush3.bf16.msra.mxu1 %v1439_v3 }
  0x7d   :  { %1345 = vmatprep.subr.bf16.mxu1 %v1440_v5 }
  0x80   :  { %1346 = vmatpush3.bf16.msra.mxu1 %v1440_v5 }
  0x81   :  { %1347 = vmatprep.subr.bf16.mxu1 %v1441_v6 }
  0x84   :  { %1348 = vmatpush3.bf16.msra.mxu1 %v1441_v6 }
  0x85   :  { %1349 = vmatprep.subr.bf16.mxu1 %v1442_v7 }
  0x88   :  { %1350 = vmatpush3.bf16.msra.mxu1 %v1442_v7 }
  0x89   :  { %1351 = vmatprep.subr.bf16.mxu1 %v1443_v8 }
  0x8c   :  { %1352 = vmatpush3.bf16.msra.mxu1 %v1443_v8 }
  0x8d   :  { %904 = vmatprep.subr.bf16.mxu1 %v1457_v52 }
  0x8f   :  { %1354 = vmatmul.mubr.bf16.vlgmr.msra.gmra.mrb[0].mxu1 %v1897_v9 }
  0x90   :  { %1357 = vmatprep.mubr.bf16.mxu1 %v1899_v10  ;;  %905 = vmatpush1.bf16.msra.mxu1 %v1455_v51 }
  0x97   :  { %1358 = vmatmul.mubr.bf16.gmra.mrb[4].mxu1 %v1903_v11 }
  0x98   :  { %1361 = vmatprep.mubr.bf16.mxu1 %v1905_v12 }
  0x9f   :  { %1362 = vmatmul.mubr.bf16.gmra.mrb[8].mxu1 %v1909_v13 }
  0xa0   :  { %1365 = vmatprep.mubr.bf16.mxu1 %v1911_v14 }
  0xa7   :  { %1366 = vmatmul.mubr.bf16.gmra.mrb[12].mxu1 %v1915_v15 }
 0x162   :  { %v1355_v17 = vpop.f32.mrb[0].mxu1 }
 0x163   :  { %v1918_v18 = vadd.f32 %v1355_v17, %v1242_v16  ;;  %v276_v19 = vpop.f32.mrb[1].mxu1 }
 0x164   :  { %v1920_v20 = vadd.f32 %v1242_v16, %v276_v19  ;;  %v1356_v21 = vpop.f32.mrb[2].mxu1 }
 0x165   :  { %343 = vadd.xlane.f32.xlu1 %v1918_v18  ;;  %v279_v22 = vpop.f32.mrb[3].mxu1  ;;  %v1924_v23 = vadd.f32 %v1356_v21, %v1242_v16 }
 0x166   :  { %339 = vadd.xlane.f32.xlu0 %v1920_v20  ;;  %v1926_v24 = vadd.f32 %v1242_v16, %v279_v22 }
 0x169   :  { %345 = vadd.xlane.f32.xlu1 %v1924_v23 }
 0x16a   :  { %v1359_v25 = vpop.f32.mrb[4].mxu1  ;;  %341 = vadd.xlane.f32.xlu0 %v1926_v24 }
 0x16b   :  { %v292_v26 = vpop.f32.mrb[5].mxu1  ;;  %v1932_v30 = vadd.f32 %v1359_v25, %v1242_v16 }
 0x16c   :  { %v1930_v27 = vadd.f32 %v1242_v16, %v292_v26  ;;  %v1360_v28 = vpop.f32.mrb[6].mxu1 }
 0x16d   :  { %v295_v29 = vpop.f32.mrb[7].mxu1  ;;  %v1937_v32 = vadd.f32 %v1360_v28, %v1242_v16 }
 0x16e   :  { %v1934_v31 = vadd.f32 %v1242_v16, %v295_v29  ;;  %347 = vadd.xlane.f32.xlu0 %v1930_v27 }
 0x170   :  { %349 = vadd.xlane.f32.xlu1 %v1934_v31 }
 0x172   :  { %v1363_v33 = vpop.f32.mrb[8].mxu1  ;;  %351 = vadd.xlane.f32.xlu0 %v1932_v30 }
 0x173   :  { %v308_v34 = vpop.f32.mrb[9].mxu1  ;;  %v1944_v38 = vadd.f32 %v1363_v33, %v1242_v16 }
 0x174   :  { %v1941_v35 = vadd.f32 %v1242_v16, %v308_v34  ;;  %v1364_v36 = vpop.f32.mrb[10].mxu1  ;;  %353 = vadd.xlane.f32.xlu1 %v1937_v32 }
 0x175   :  { %v311_v37 = vpop.f32.mrb[11].mxu1  ;;  %v1949_v40 = vadd.f32 %v1364_v36, %v1242_v16 }
 0x176   :  { %v1946_v39 = vadd.f32 %v1242_v16, %v311_v37  ;;  %355 = vadd.xlane.f32.xlu0 %v1941_v35 }
 0x178   :  { %357 = vadd.xlane.f32.xlu1 %v1946_v39 }
 0x17a   :  { %v1367_v41 = vpop.f32.mrb[12].mxu1  ;;  %359 = vadd.xlane.f32.xlu0 %v1944_v38 }
 0x17b   :  { %v324_v42 = vpop.f32.mrb[13].mxu1  ;;  %v1956_v46 = vadd.f32 %v1367_v41, %v1242_v16 }
 0x17c   :  { %v1953_v43 = vadd.f32 %v1242_v16, %v324_v42  ;;  %v1368_v44 = vpop.f32.mrb[14].mxu1  ;;  %361 = vadd.xlane.f32.xlu1 %v1949_v40 }
 0x17d   :  { %v327_v45 = vpop.f32.mrb[15].mxu1  ;;  %v1961_v48 = vadd.f32 %v1368_v44, %v1242_v16 }
 0x17e   :  { %v1958_v47 = vadd.f32 %v1242_v16, %v327_v45  ;;  %363 = vadd.xlane.f32.xlu0 %v1953_v43 }
 0x180   :  { %365 = vadd.xlane.f32.xlu1 %v1958_v47 }
 0x182   :  { %367 = vadd.xlane.f32.xlu0 %v1956_v46 }
 0x184   :  { %369 = vadd.xlane.f32.xlu1 %v1961_v48 }
 0x1f2   :  { %v344_v55 = vpop.xlane.xlu1 %343 }
 0x1f3   :  { %v373_v56 = vmul.f32 0.015625, %v344_v55  ;;  %v340_v57 = vpop.xlane.xlu0 %339 }
 0x1f4   :  { %v371_v58 = vmul.f32 0.015625, %v340_v57  ;;  %v1463_v57 = vld [vmem:[#allocation8 + $0x14] ss:$8 sps:$4 sm:$0xff]  }
 0x1f5   :  { %v389_v60 = vsub.f32 %v1918_v18, %v373_v56  ;;  %906 = vmatprep.subr.bf16.mxu1 %v1463_v57  ;;  %v1487_v57 = vld [vmem:[#allocation8 + $0x54] ss:$8 sps:$4 sm:$0xff]  }
 0x1f6   :  { %v387_v61 = vsub.f32 %v1920_v20, %v371_v58  ;;  %v346_v62 = vpop.xlane.xlu1 %345 }
 0x1f7   :  { %v374_v63 = vmul.f32 0.015625, %v346_v62  ;;  %v342_v0 = vpop.xlane.xlu0 %341  ;;  %v1978_v7 = vmul.f32 %v1966_v59, %v389_v60 }
 0x1f8   :  { %v372_v1 = vmul.f32 0.015625, %v342_v0  ;;  %v1971_v2 = vmul.f32 %v1966_v59, %v387_v61 }
 0x1f9   :  { %v390_v3 = vsub.f32 %v1924_v23, %v374_v63  ;;  %v425_v22 = vmul.f32 %v1978_v7, %v1978_v7  ;;  %v1464_v63 = vld [vmem:[#allocation10 + $0x24] ss:$8 sps:$4 sm:$0xff]  }
 0x1fa   :  { %v388_v5 = vsub.f32 %v1926_v24, %v372_v1  ;;  %v423_v6 = vmul.f32 %v1971_v2, %v1971_v2  ;;  %v1466_v1 = vld [vmem:[#allocation10 + $0x20] ss:$8 sps:$4 sm:$0xff]   ;;  %715 = vmatprep.subr.bf16.mxu0 %v1464_v63  ;;  %v1494_v63 = vld [vmem:[#allocation10 + $0x74] ss:$8 sps:$4 sm:$0xff]  }
 0x1fb   :  { %v348_v8 = vpop.xlane.xlu0 %347  ;;  %v1984_v19 = vmul.f32 %v1966_v59, %v390_v3  ;;  %716 = vmatpush1.bf16.msra.mxu0 %v1466_v1  ;;  %v1499_v1 = vld [vmem:[#allocation8 + $0x74] ss:$8 sps:$4 sm:$0xff]  }
 0x1fc   :  { %v375_v16 = vmul.f32 0.015625, %v348_v8  ;;  %439 = vadd.xlane.f32.xlu0 %v423_v6  ;;  %v1981_v17 = vmul.f32 %v1966_v59, %v388_v5 }
 0x1fd   :  { %v350_v18 = vpop.xlane.xlu1 %349 }
 0x1fe   :  { %v391_v20 = vsub.f32 %v1930_v27, %v375_v16  ;;  %v376_v21 = vmul.f32 0.015625, %v350_v18  ;;  %v424_v23 = vmul.f32 %v1981_v17, %v1981_v17  ;;  %v426_v27 = vmul.f32 %v1984_v19, %v1984_v19 }
 0x1ff   :  { %v352_v24 = vpop.xlane.xlu0 %351 }
 0x200   :  { %v392_v25 = vsub.f32 %v1934_v31, %v376_v21  ;;  %v377_v26 = vmul.f32 0.015625, %v352_v24  ;;  %443 = vadd.xlane.f32.xlu0 %v425_v22  ;;  %441 = vadd.xlane.f32.xlu1 %v424_v23  ;;  %v1993_v28 = vmul.f32 %v1966_v59, %v391_v20  ;;  %v1469_v21 = vld [vmem:[#allocation8 + $0x24] ss:$8 sps:$4 sm:$0xff]   ;;  %v1467_v23 = vld [vmem:[#allocation8 + $0x20] ss:$8 sps:$4 sm:$0xff]  }
 0x201   :  { %v354_v29 = vpop.xlane.xlu1 %353  ;;  %v1470_v24 = vld [vmem:[#allocation10 + $0x34] ss:$8 sps:$4 sm:$0xff]  }
 0x202   :  { %v393_v33 = vsub.f32 %v1932_v30, %v377_v26  ;;  %v378_v34 = vmul.f32 0.015625, %v354_v29  ;;  %v427_v36 = vmul.f32 %v1993_v28, %v1993_v28  ;;  %v2001_v37 = vmul.f32 %v1966_v59, %v392_v25  ;;  %717 = vmatprep.subr.bf16.mxu0 %v1470_v24 }
 0x203   :  { %v356_v31 = vpop.xlane.xlu0 %355 }
 0x204   :  { %v394_v41 = vsub.f32 %v1937_v32, %v378_v34  ;;  %v379_v42 = vmul.f32 0.015625, %v356_v31  ;;  %445 = vadd.xlane.f32.xlu1 %v426_v27  ;;  %447 = vadd.xlane.f32.xlu0 %v427_v36  ;;  %v2005_v44 = vmul.f32 %v1966_v59, %v393_v33  ;;  %v428_v30 = vmul.f32 %v2001_v37, %v2001_v37 }
 0x205   :  { %v358_v45 = vpop.xlane.xlu1 %357 }
 0x206   :  { %v395_v49 = vsub.f32 %v1941_v35, %v379_v42  ;;  %v380_v50 = vmul.f32 0.015625, %v358_v45  ;;  %v429_v51 = vmul.f32 %v2005_v44, %v2005_v44  ;;  %v2013_v52 = vmul.f32 %v1966_v59, %v394_v41  ;;  %v1475_v41 = vld [vmem:[#allocation8 + $0x34] ss:$8 sps:$4 sm:$0xff]   ;;  %v1473_v42 = vld [vmem:[#allocation8 + $0x30] ss:$8 sps:$4 sm:$0xff]  }
 0x207   :  { %v360_v32 = vpop.xlane.xlu0 %359  ;;  %v1476_v45 = vld [vmem:[#allocation10 + $0x44] ss:$8 sps:$4 sm:$0xff]  }
 0x208   :  { %v396_v53 = vsub.f32 %v1946_v39, %v380_v50  ;;  %v381_v54 = vmul.f32 0.015625, %v360_v32  ;;  %449 = vadd.xlane.f32.xlu1 %v428_v30  ;;  %451 = vadd.xlane.f32.xlu0 %v429_v51  ;;  %v2017_v55 = vmul.f32 %v1966_v59, %v395_v49  ;;  %v430_v35 = vmul.f32 %v2013_v52, %v2013_v52  ;;  %v1461_v39 = vld [vmem:[#allocation8 + $0x10] ss:$8 sps:$4 sm:$0xff]  }
 0x209   :  { %v362_v56 = vpop.xlane.xlu1 %361  ;;  %907 = vmatpush1.bf16.msra.mxu1 %v1461_v39  ;;  %v1491_v39 = vld [vmem:[#allocation8 + $0x60] ss:$8 sps:$4 sm:$0xff]  }
 0x20a   :  { %v397_v58 = vsub.f32 %v1944_v38, %v381_v54  ;;  %v382_v60 = vmul.f32 0.015625, %v362_v56  ;;  %v431_v61 = vmul.f32 %v2017_v55, %v2017_v55  ;;  %v2025_v62 = vmul.f32 %v1966_v59, %v396_v53  ;;  %908 = vmatprep.subr.bf16.mxu1 %v1469_v21  ;;  %v1479_v53 = vld [vmem:[#allocation8 + $0x40] ss:$8 sps:$4 sm:$0xff]   ;;  %v1482_v54 = vld [vmem:[#allocation10 + $0x54] ss:$8 sps:$4 sm:$0xff]  }
 0x20b   :  { %v364_v0 = vpop.xlane.xlu0 %363  ;;  %v1484_v56 = vld [vmem:[#allocation10 + $0x50] ss:$8 sps:$4 sm:$0xff]  }
 0x20c   :  { %v398_v3 = vsub.f32 %v1949_v40, %v382_v60  ;;  %v383_v5 = vmul.f32 0.015625, %v364_v0  ;;  %453 = vadd.xlane.f32.xlu1 %v430_v35  ;;  %455 = vadd.xlane.f32.xlu0 %v431_v61  ;;  %v2029_v6 = vmul.f32 %v1966_v59, %v397_v58  ;;  %v432_v8 = vmul.f32 %v2025_v62, %v2025_v62  ;;  %v1485_v58 = vld [vmem:[#allocation8 + $0x50] ss:$8 sps:$4 sm:$0xff]   ;;  %v1488_v60 = vld [vmem:[#allocation10 + $0x64] ss:$8 sps:$4 sm:$0xff]  }
 0x20d   :  { %v366_v38 = vpop.xlane.xlu1 %365  ;;  %909 = vmatpush1.bf16.msra.mxu1 %v1467_v23  ;;  %v1493_v61 = vld [vmem:[#allocation8 + $0x64] ss:$8 sps:$4 sm:$0xff]   ;;  %v1496_v0 = vld [vmem:[#allocation10 + $0x70] ss:$8 sps:$4 sm:$0xff]  }
 0x20e   :  { %v399_v16 = vsub.f32 %v1953_v43, %v383_v5  ;;  %v384_v18 = vmul.f32 0.015625, %v366_v38  ;;  %v433_v20 = vmul.f32 %v2029_v6, %v2029_v6  ;;  %v2037_v40 = vmul.f32 %v1966_v59, %v398_v3  ;;  %v1472_v43 = vld [vmem:[#allocation10 + $0x30] ss:$8 sps:$4 sm:$0xff]   ;;  %910 = vmatprep.subr.bf16.mxu1 %v1475_v41 }
 0x20f   :  { %v368_v22 = vpop.xlane.xlu0 %367  ;;  %718 = vmatpush1.bf16.msra.mxu0 %v1472_v43  ;;  %v1497_v3 = vld [vmem:[#allocation8 + $0x70] ss:$8 sps:$4 sm:$0xff]   ;;  %v1770_v5 = vmov 0  }
 0x210   :  { %v400_v25 = vsub.f32 %v1958_v47, %v384_v18  ;;  %v385_v26 = vmul.f32 0.015625, %v368_v22  ;;  %457 = vadd.xlane.f32.xlu1 %v432_v8  ;;  %459 = vadd.xlane.f32.xlu0 %v433_v20  ;;  %v2041_v29 = vmul.f32 %v1966_v59, %v399_v16  ;;  %v434_v33 = vmul.f32 %v2037_v40, %v2037_v40  ;;  %v2082_v43 = vld [vmem:[#allocation5 + $0x2] ss:$0 sm:$0xff] }
 0x211   :  { %v370_v27 = vpop.xlane.xlu1 %369  ;;  %719 = vmatprep.subr.bf16.mxu0 %v1476_v45  ;;  %911 = vmatpush1.bf16.msra.mxu1 %v1473_v42 }
 0x212   :  { %v401_v34 = vsub.f32 %v1956_v46, %v385_v26  ;;  %v386_v36 = vmul.f32 0.015625, %v370_v27  ;;  %v435_v31 = vmul.f32 %v2041_v29, %v2041_v29  ;;  %v2049_v47 = vmul.f32 %v1966_v59, %v400_v25  ;;  %v1478_v46 = vld [vmem:[#allocation10 + $0x40] ss:$8 sps:$4 sm:$0xff]   ;;  %743 = vmatprep.mubr.bf16.mxu0 %v1770_v5  ;;  %936 = vmatprep.mubr.bf16.mxu1 %v1770_v5 }
 0x213   :  { %720 = vmatpush1.bf16.msra.mxu0 %v1478_v46  ;;  %1435 = vset.pattern.permute.xlu0 %v1770_v5 }
 0x214   :  { %v402_v30 = vsub.f32 %v1961_v48, %v386_v36  ;;  %461 = vadd.xlane.f32.xlu1 %v434_v33  ;;  %463 = vadd.xlane.f32.xlu0 %v435_v31  ;;  %v2053_v49 = vmul.f32 %v1966_v59, %v401_v34  ;;  %v436_v50 = vmul.f32 %v2049_v47, %v2049_v47  ;;  %v1481_v48 = vld [vmem:[#allocation8 + $0x44] ss:$8 sps:$4 sm:$0xff]  }
 0x215   :  { %912 = vmatprep.subr.bf16.mxu1 %v1481_v48  ;;  %721 = vmatprep.subr.bf16.mxu0 %v1482_v54 }
 0x216   :  { %v437_v51 = vmul.f32 %v2053_v49, %v2053_v49  ;;  %v2060_v32 = vmul.f32 %v1966_v59, %v402_v30  ;;  %913 = vmatpush1.bf16.msra.mxu1 %v1479_v53  ;;  %v1490_v59 = vld [vmem:[#allocation10 + $0x60] ss:$8 sps:$4 sm:$0xff]   ;;  %v2086_v30 = vld [vmem:[#allocation5 + $0x3] ss:$0 sm:$0xff] }
 0x217   :  { %722 = vmatpush1.bf16.msra.mxu0 %v1484_v56  ;;  %914 = vmatprep.subr.bf16.mxu1 %v1487_v57 }
 0x218   :  { %465 = vadd.xlane.f32.xlu1 %v436_v50  ;;  %467 = vadd.xlane.f32.xlu0 %v437_v51  ;;  %v438_v35 = vmul.f32 %v2060_v32, %v2060_v32 }
 0x219   :  { %723 = vmatprep.subr.bf16.mxu0 %v1488_v60 }
 0x21a   :  { %915 = vmatpush1.bf16.msra.mxu1 %v1485_v58 }
 0x21b   :  { %724 = vmatpush1.bf16.msra.mxu0 %v1490_v59  ;;  %916 = vmatprep.subr.bf16.mxu1 %v1493_v61 }
 0x21c   :  { %469 = vadd.xlane.f32.xlu1 %v438_v35  ;;  %725 = vmatprep.subr.bf16.mxu0 %v1494_v63 }
 0x21e   :  { %917 = vmatpush1.bf16.msra.mxu1 %v1491_v39 }
 0x21f   :  { %726 = vmatpush1.bf16.msra.mxu0 %v1496_v0  ;;  %918 = vmatprep.subr.bf16.mxu1 %v1499_v1 }
 0x222   :  { %744 = vmatmul.mubr.bf16.vlgmr.msra.gmra.mrb[0].mxu0 %v1894_v4  ;;  %919 = vmatpush1.bf16.msra.mxu1 %v1497_v3 }
 0x223   :  { %753 = vmatprep.mubr.bf16.mxu0 %v1770_v5 }
 0x22a   :  { %754 = vmatmul.mubr.bf16.gmra.mrb[4].mxu0 %v1897_v9 }
 0x22b   :  { %763 = vmatprep.mubr.bf16.mxu0 %v1770_v5 }
 0x232   :  { %764 = vmatmul.mubr.bf16.gmra.mrb[8].mxu0 %v1899_v10 }
 0x233   :  { %773 = vmatprep.mubr.bf16.mxu0 %v1770_v5 }
 0x23a   :  { %774 = vmatmul.mubr.bf16.gmra.mrb[12].mxu0 %v1903_v11 }
 0x23b   :  { %783 = vmatprep.mubr.bf16.mxu0 %v1770_v5 }
 0x242   :  { %784 = vmatmul.mubr.bf16.gmra.mrb[16].mxu0 %v1905_v12 }
 0x243   :  { %793 = vmatprep.mubr.bf16.mxu0 %v1770_v5 }
 0x24a   :  { %794 = vmatmul.mubr.bf16.gmra.mrb[20].mxu0 %v1909_v13 }
 0x24b   :  { %803 = vmatprep.mubr.bf16.mxu0 %v1770_v5 }
 0x252   :  { %804 = vmatmul.mubr.bf16.gmra.mrb[24].mxu0 %v1911_v14 }
 0x253   :  { %813 = vmatprep.mubr.bf16.mxu0 %v1770_v5 }
 0x25a   :  { %814 = vmatmul.mubr.bf16.gmra.mrb[28].mxu0 %v1915_v15 }
 0x289   :  { %v440_v4 = vpop.xlane.xlu0 %439 }
 0x28a   :  { %v471_v9 = vmul.f32 0.015625, %v440_v4 }
 0x28c   :  { %v487_v10 = vadd.f32 1e-05, %v471_v9 }
 0x28d   :  { %v442_v11 = vpop.xlane.xlu1 %441  ;;  %v444_v38 = vpop.xlane.xlu0 %443 }
 0x28e   :  { %1500 = vrsqrt.f32 %v487_v10  ;;  %v472_v8 = vmul.f32 0.015625, %v442_v11  ;;  %v473_v12 = vmul.f32 0.015625, %v444_v38 }
 0x290   :  { %v488_v16 = vadd.f32 1e-05, %v472_v8  ;;  %v489_v18 = vadd.f32 1e-05, %v473_v12 }
 0x291   :  { %v446_v20 = vpop.xlane.xlu1 %445  ;;  %v448_v13 = vpop.xlane.xlu0 %447 }
 0x292   :  { %1502 = vrsqrt.f32 %v488_v16  ;;  %v474_v21 = vmul.f32 0.015625, %v446_v20  ;;  %v475_v22 = vmul.f32 0.015625, %v448_v13 }
 0x293   :  { %1504 = vrsqrt.f32 %v489_v18 }
 0x294   :  { %v490_v14 = vadd.f32 1e-05, %v474_v21  ;;  %v491_v23 = vadd.f32 1e-05, %v475_v22 }
 0x295   :  { %v450_v24 = vpop.xlane.xlu1 %449  ;;  %v452_v25 = vpop.xlane.xlu0 %451 }
 0x296   :  { %1506 = vrsqrt.f32 %v490_v14  ;;  %v476_v15 = vmul.f32 0.015625, %v450_v24  ;;  %v477_v36 = vmul.f32 0.015625, %v452_v25 }
 0x297   :  { %1508 = vrsqrt.f32 %v491_v23 }
 0x298   :  { %v1501_v26 = vpop.eup %1500  ;;  %v492_v27 = vadd.f32 1e-05, %v476_v15  ;;  %v493_v48 = vadd.f32 1e-05, %v477_v36 }
 0x299   :  { %v519_v33 = vmul.f32 %v1501_v26, %v1971_v2  ;;  %v454_v34 = vpop.xlane.xlu1 %453  ;;  %v456_v54 = vpop.xlane.xlu0 %455 }
 0x29a   :  { %1510 = vrsqrt.f32 %v492_v27  ;;  %v478_v31 = vmul.f32 0.015625, %v454_v34  ;;  %v479_v59 = vmul.f32 0.015625, %v456_v54 }
 0x29b   :  { %v539_v41 = vmul.f32 %v2082_v43, %v519_v33 }
 0x29c   :  { %v1503_v42 = vpop.eup %1502  ;;  %v494_v45 = vadd.f32 1e-05, %v478_v31  ;;  %v495_v11 = vadd.f32 1e-05, %v479_v59 }
 0x29d   :  { %v1505_v46 = vpop.eup %1504  ;;  %v520_v50 = vmul.f32 %v1503_v42, %v1981_v17  ;;  %v458_v51 = vpop.xlane.xlu1 %457  ;;  %v559_v2 = vadd.f32 %v2086_v30, %v539_v41 }
 0x29e   :  { %v521_v56 = vmul.f32 %v1505_v46, %v1978_v7  ;;  %1512 = vrsqrt.f32 %v494_v45  ;;  %v480_v57 = vmul.f32 0.015625, %v458_v51  ;;  %v460_v38 = vpop.xlane.xlu0 %459 }
 0x29f   :  { %v540_v53 = vmul.f32 %v2082_v43, %v520_v50  ;;  %1514 = vrsqrt.f32 %v493_v48  ;;  %v575_v17 = vmax.f32 %v559_v2, 0.0  ;;  %v481_v13 = vmul.f32 0.015625, %v460_v38 }
 0x2a0   :  { %v1507_v35 = vpop.eup %1506  ;;  %v541_v63 = vmul.f32 %v2082_v43, %v521_v56  ;;  %v496_v3 = vadd.f32 1e-05, %v480_v57 }
 0x2a1   :  { %v560_v58 = vadd.f32 %v2086_v30, %v540_v53  ;;  %v522_v60 = vmul.f32 %v1507_v35, %v1984_v19  ;;  %v1509_v61 = vpop.eup %1508  ;;  %v462_v4 = vpop.xlane.xlu1 %461  ;;  %v497_v25 = vadd.f32 1e-05, %v481_v13 }
 0x2a2   :  { %v561_v19 = vadd.f32 %v2086_v30, %v541_v63  ;;  %v523_v8 = vmul.f32 %v1509_v61, %v1993_v28  ;;  %1516 = vrsqrt.f32 %v496_v3  ;;  %v482_v12 = vmul.f32 0.015625, %v462_v4  ;;  %v464_v26 = vpop.xlane.xlu0 %463 }
 0x2a3   :  { %v576_v39 = vmax.f32 %v560_v58, 0.0  ;;  %v542_v0 = vmul.f32 %v2082_v43, %v522_v60  ;;  %1518 = vrsqrt.f32 %v495_v11  ;;  %v483_v42 = vmul.f32 0.015625, %v464_v26 }
 0x2a4   :  { %v1511_v1 = vpop.eup %1510  ;;  %v577_v21 = vmax.f32 %v561_v19, 0.0  ;;  %v498_v14 = vadd.f32 1e-05, %v482_v12 }
 0x2a5   :  { %v591_v7 = vpack.c.bf16 %v576_v39, %v575_v17  ;;  %v562_v9 = vadd.f32 %v2086_v30, %v542_v0  ;;  %v524_v10 = vmul.f32 %v1511_v1, %v2001_v37  ;;  %v543_v37 = vmul.f32 %v2082_v43, %v523_v8  ;;  %v466_v23 = vpop.xlane.xlu1 %465 }
 0x2a6   :  { %1520 = vrsqrt.f32 %v498_v14  ;;  %v484_v34 = vmul.f32 0.015625, %v466_v23  ;;  %v499_v54 = vadd.f32 1e-05, %v483_v42  ;;  %v468_v2 = vpop.xlane.xlu0 %467 }
 0x2a7   :  { %937 = vmatmul.mubr.bf16.vlgmr.msra.gmra.mrb[16].mxu1 %v591_v7  ;;  %v578_v16 = vmax.f32 %v562_v9, 0.0  ;;  %v544_v18 = vmul.f32 %v2082_v43, %v524_v10  ;;  %v563_v27 = vadd.f32 %v2086_v30, %v543_v37  ;;  %1522 = vrsqrt.f32 %v497_v25 }
 0x2a8   :  { %946 = vmatprep.mubr.bf16.mxu1 %v1770_v5  ;;  %v1513_v20 = vpop.eup %1512  ;;  %v500_v50 = vadd.f32 1e-05, %v484_v34  ;;  %v485_v61 = vmul.f32 0.015625, %v468_v2 }
 0x2a9   :  { %v1515_v22 = vpop.eup %1514  ;;  %v592_v24 = vpack.c.bf16 %v578_v16, %v577_v21  ;;  %v564_v15 = vadd.f32 %v2086_v30, %v544_v18  ;;  %v526_v28 = vmul.f32 %v1513_v20, %v2013_v52  ;;  %v579_v45 = vmax.f32 %v563_v27, 0.0  ;;  %v470_v51 = vpop.xlane.xlu1 %469 }
 0x2aa   :  { %v525_v33 = vmul.f32 %v1515_v22, %v2005_v44  ;;  %1524 = vrsqrt.f32 %v500_v50  ;;  %v486_v57 = vmul.f32 0.015625, %v470_v51  ;;  %v501_v3 = vadd.f32 1e-05, %v485_v61 }
 0x2ab   :  { %v580_v36 = vmax.f32 %v564_v15, 0.0  ;;  %v546_v31 = vmul.f32 %v2082_v43, %v526_v28  ;;  %1526 = vrsqrt.f32 %v499_v54  ;;  %v1771_v61 = vmov 0.0  }
 0x2ac   :  { %v1517_v41 = vpop.eup %1516  ;;  %v545_v52 = vmul.f32 %v2082_v43, %v525_v33  ;;  %v502_v63 = vadd.f32 1e-05, %v486_v57  ;;  %1369 = vmatprep.subr.bf16.mxu0 %v1771_v61  ;;  %1385 = vmatprep.mubr.msk.bf16.mxu0 %vm1772_vm0, %v1771_v61 }
 0x2ad   :  { %v1519_v46 = vpop.eup %1518  ;;  %v593_v48 = vpack.c.bf16 %v580_v36, %v579_v45  ;;  %v566_v53 = vadd.f32 %v2086_v30, %v546_v31  ;;  %v528_v44 = vmul.f32 %v1517_v41, %v2025_v62 }
 0x2ae   :  { %v565_v56 = vadd.f32 %v2086_v30, %v545_v52  ;;  %v527_v35 = vmul.f32 %v1519_v46, %v2017_v55  ;;  %1528 = vrsqrt.f32 %v502_v63 }
 0x2af   :  { %947 = vmatmul.mubr.bf16.gmra.mrb[20].mxu1 %v592_v24  ;;  %v582_v58 = vmax.f32 %v566_v53, 0.0  ;;  %v548_v60 = vmul.f32 %v2082_v43, %v528_v44  ;;  %1530 = vrsqrt.f32 %v501_v3 }
 0x2b0   :  { %956 = vmatprep.mubr.bf16.mxu1 %v1770_v5  ;;  %v1521_v59 = vpop.eup %1520  ;;  %v581_v17 = vmax.f32 %v565_v56, 0.0  ;;  %v547_v62 = vmul.f32 %v2082_v43, %v527_v35 }
 0x2b1   :  { %v1523_v39 = vpop.eup %1522  ;;  %v568_v1 = vadd.f32 %v2086_v30, %v548_v60  ;;  %v530_v55 = vmul.f32 %v1521_v59, %v2037_v40 }
 0x2b2   :  { %v594_v0 = vpack.c.bf16 %v582_v58, %v581_v17  ;;  %v567_v4 = vadd.f32 %v2086_v30, %v547_v62  ;;  %v529_v7 = vmul.f32 %v1523_v39, %v2029_v6 }
 0x2b3   :  { %v584_v9 = vmax.f32 %v568_v1, 0.0  ;;  %v550_v10 = vmul.f32 %v2082_v43, %v530_v55 }
 0x2b4   :  { %v1525_v11 = vpop.eup %1524  ;;  %v583_v38 = vmax.f32 %v567_v4, 0.0  ;;  %v549_v19 = vmul.f32 %v2082_v43, %v529_v7 }
 0x2b5   :  { %v1527_v8 = vpop.eup %1526  ;;  %v570_v40 = vadd.f32 %v2086_v30, %v550_v10  ;;  %v532_v16 = vmul.f32 %v1525_v11, %v2049_v47  ;;  %v125_v10 = vld [vmem:[#allocation5 + $0x6] sm:$0x1] }
 0x2b6   :  { %v595_v12 = vpack.c.bf16 %v584_v9, %v583_v38  ;;  %v569_v6 = vadd.f32 %v2086_v30, %v549_v19  ;;  %v531_v18 = vmul.f32 %v1527_v8, %v2041_v29  ;;  %1180 = vperm.xlu0 %1435, %v125_v10   ;;  %v2189_v19 = vld [vmem:[#allocation5 + $0x5] ss:$0 sm:$0xff] }
 0x2b7   :  { %957 = vmatmul.mubr.bf16.gmra.mrb[24].mxu1 %v593_v48  ;;  %v586_v20 = vmax.f32 %v570_v40, 0.0  ;;  %v552_v13 = vmul.f32 %v2082_v43, %v532_v16 }
 0x2b8   :  { %966 = vmatprep.mubr.bf16.mxu1 %v1770_v5  ;;  %v1529_v21 = vpop.eup %1528  ;;  %v585_v37 = vmax.f32 %v569_v6, 0.0  ;;  %v551_v22 = vmul.f32 %v2082_v43, %v531_v18 }
 0x2b9   :  { %v1531_v14 = vpop.eup %1530  ;;  %v572_v24 = vadd.f32 %v2086_v30, %v552_v13  ;;  %v534_v47 = vmul.f32 %v1529_v21, %v2060_v32 }
 0x2ba   :  { %v596_v23 = vpack.c.bf16 %v586_v20, %v585_v37  ;;  %v571_v15 = vadd.f32 %v2086_v30, %v551_v22  ;;  %v533_v29 = vmul.f32 %v1531_v14, %v2053_v49 }
 0x2bb   :  { %v588_v28 = vmax.f32 %v572_v24, 0.0  ;;  %v554_v25 = vmul.f32 %v2082_v43, %v534_v47 }
 0x2bc   :  { %v587_v26 = vmax.f32 %v571_v15, 0.0  ;;  %v553_v27 = vmul.f32 %v2082_v43, %v533_v29 }
 0x2bd   :  { %v574_v34 = vadd.f32 %v2086_v30, %v554_v25 }
 0x2be   :  { %v597_v33 = vpack.c.bf16 %v588_v28, %v587_v26  ;;  %v573_v36 = vadd.f32 %v2086_v30, %v553_v27 }
 0x2bf   :  { %967 = vmatmul.mubr.bf16.gmra.mrb[28].mxu1 %v594_v0  ;;  %v590_v32 = vmax.f32 %v574_v34, 0.0 }
 0x2c0   :  { %976 = vmatprep.mubr.bf16.mxu1 %v1770_v5  ;;  %v589_v31 = vmax.f32 %v573_v36, 0.0 }
 0x2c2   :  { %v598_v41 = vpack.c.bf16 %v590_v32, %v589_v31 }
 0x2c7   :  { %977 = vmatmul.mubr.bf16.gmra.mrb[32].mxu1 %v595_v12 }
 0x2c8   :  { %986 = vmatprep.mubr.bf16.mxu1 %v1770_v5 }
 0x2cf   :  { %987 = vmatmul.mubr.bf16.gmra.mrb[36].mxu1 %v596_v23 }
 0x2d0   :  { %996 = vmatprep.mubr.bf16.mxu1 %v1770_v5 }
 0x2d7   :  { %997 = vmatmul.mubr.bf16.gmra.mrb[40].mxu1 %v597_v33 }
 0x2d8   :  { %1006 = vmatprep.mubr.bf16.mxu1 %v1770_v5 }
 0x2df   :  { %1007 = vmatmul.mubr.bf16.gmra.mrb[44].mxu1 %v598_v41 }
 0x2f5   :  { %v745_v49 = vpop.f32.mrb[0].mxu0 }
 0x2f6   :  { %v747_v42 = vpop.f32.mrb[1].mxu0 }
 0x2f7   :  { %v749_v45 = vpop.f32.mrb[2].mxu0 }
 0x2f8   :  { %v751_v52 = vpop.f32.mrb[3].mxu0 }
 0x2fd   :  { %v755_v46 = vpop.f32.mrb[4].mxu0 }
 0x2fe   :  { %v757_v50 = vpop.f32.mrb[5].mxu0 }
 0x2ff   :  { %v759_v51 = vpop.f32.mrb[6].mxu0 }
 0x300   :  { %v761_v43 = vpop.f32.mrb[7].mxu0 }
 0x305   :  { %v765_v48 = vpop.f32.mrb[8].mxu0 }
 0x306   :  { %v767_v53 = vpop.f32.mrb[9].mxu0 }
 0x307   :  { %v2141_v44 = vpop.f32.mrb[10].mxu0 }
 0x308   :  { %v2143_v54 = vpop.f32.mrb[11].mxu0 }
 0x30d   :  { %v2145_v30 = vpop.f32.mrb[12].mxu0 }
 0x30e   :  { %v2147_v5 = vpop.f32.mrb[13].mxu0 }
 0x30f   :  { %v2149_v2 = vpop.f32.mrb[14].mxu0 }
 0x310   :  { %v2151_v56 = vpop.f32.mrb[15].mxu0 }
 0x315   :  { %v2153_v35 = vpop.f32.mrb[16].mxu0 }
 0x316   :  { %v2155_v57 = vpop.f32.mrb[17].mxu0 }
 0x317   :  { %v2157_v58 = vpop.f32.mrb[18].mxu0 }
 0x318   :  { %v2159_v60 = vpop.f32.mrb[19].mxu0 }
 0x31d   :  { %v2161_v59 = vpop.f32.mrb[20].mxu0 }
 0x31e   :  { %v2164_v17 = vpop.f32.mrb[21].mxu0 }
 0x31f   :  { %v2166_v62 = vpop.f32.mrb[22].mxu0 }
 0x320   :  { %v2168_v39 = vpop.f32.mrb[23].mxu0 }
 0x325   :  { %v2170_v63 = vpop.f32.mrb[24].mxu0 }
 0x326   :  { %v2172_v0 = vpop.f32.mrb[25].mxu0 }
 0x327   :  { %v2174_v1 = vpop.f32.mrb[26].mxu0 }
 0x328   :  { %v2176_v55 = vpop.f32.mrb[27].mxu0 }
 0x32d   :  { %v2178_v3 = vpop.f32.mrb[28].mxu0 }
 0x32e   :  { %v2180_v4 = vpop.f32.mrb[29].mxu0 }
 0x32f   :  { %v2182_v7 = vpop.f32.mrb[30].mxu0 }
 0x330   :  { %v2184_v9 = vpop.f32.mrb[31].mxu0 }
 0x37a   :  { %v938_v11 = vpop.f32.mrb[16].mxu1 }
 0x37b   :  { %v2187_v38 = vadd.f32 %v938_v11, %v745_v49  ;;  %v940_v8 = vpop.f32.mrb[17].mxu1 }
 0x37c   :  { %v941_v12 = vadd.f32 %v940_v8, %v747_v42  ;;  %v942_v40 = vpop.f32.mrb[18].mxu1 }
 0x37d   :  { %v2191_v16 = vadd.f32 %v942_v40, %v749_v45  ;;  %v944_v6 = vpop.f32.mrb[19].mxu1 }
 0x37e   :  { %v1041_v18 = vadd.f32 %v2189_v19, %v941_v12  ;;  %v945_v20 = vadd.f32 %v944_v6, %v751_v52 }
 0x380   :  { %v1296_v13 = vmul.f32 -1.442695, %v1041_v18  ;;  %v1042_v21 = vadd.f32 %v2189_v19, %v945_v20  ;;  %v2213_v18 = vld [vmem:[#allocation5 + $0x4] ss:$0 sm:$0xff] }
 0x382   :  { %1532 = vpow2.f32 %v1296_v13  ;;  %v1297_v37 = vmul.f32 -1.442695, %v1042_v21  ;;  %v948_v22 = vpop.f32.mrb[20].mxu1 }
 0x383   :  { %v2195_v14 = vadd.f32 %v948_v22, %v755_v46  ;;  %v950_v23 = vpop.f32.mrb[21].mxu1 }
 0x384   :  { %1534 = vpow2.f32 %v1297_v37  ;;  %v951_v24 = vadd.f32 %v950_v23, %v757_v50  ;;  %v952_v47 = vpop.f32.mrb[22].mxu1  ;;  %v1021_v23 = vadd.f32 %v2213_v18, %v2187_v38 }
 0x385   :  { %v2197_v15 = vadd.f32 %v952_v47, %v759_v51  ;;  %v954_v29 = vpop.f32.mrb[23].mxu1 }
 0x386   :  { %v1043_v28 = vadd.f32 %v2189_v19, %v951_v24  ;;  %v955_v25 = vadd.f32 %v954_v29, %v761_v43 }
 0x388   :  { %v1298_v26 = vmul.f32 -1.442695, %v1043_v28  ;;  %v1044_v27 = vadd.f32 %v2189_v19, %v955_v25 }
 0x38a   :  { %1536 = vpow2.f32 %v1298_v26  ;;  %v1299_v33 = vmul.f32 -1.442695, %v1044_v27  ;;  %v958_v34 = vpop.f32.mrb[24].mxu1 }
 0x38b   :  { %v2201_v36 = vadd.f32 %v958_v34, %v765_v48  ;;  %v960_v32 = vpop.f32.mrb[25].mxu1 }
 0x38c   :  { %v1533_v31 = vpop.eup %1532  ;;  %1538 = vpow2.f32 %v1299_v33  ;;  %v961_v41 = vadd.f32 %v960_v32, %v767_v53  ;;  %v962_v49 = vpop.f32.mrb[26].mxu1 }
 0x38d   :  { %v1105_v42 = vadd.f32 1.0, %v1533_v31  ;;  %v2204_v45 = vadd.f32 %v962_v49, %v2141_v44  ;;  %v964_v52 = vpop.f32.mrb[27].mxu1 }
 0x38e   :  { %v1535_v46 = vpop.eup %1534  ;;  %v1045_v50 = vadd.f32 %v2189_v19, %v961_v41  ;;  %v965_v51 = vadd.f32 %v964_v52, %v2143_v54 }
 0x38f   :  { %1540 = vrcp.f32 %v1105_v42  ;;  %v1106_v43 = vadd.f32 1.0, %v1535_v46 }
 0x390   :  { %v1300_v10 = vmul.f32 -1.442695, %v1045_v50  ;;  %v1046_v48 = vadd.f32 %v2189_v19, %v965_v51  ;;  %v1023_v50 = vadd.f32 %v2213_v18, %v2195_v14 }
 0x391   :  { %1542 = vrcp.f32 %v1106_v43 }
 0x392   :  { %1544 = vpow2.f32 %v1300_v10  ;;  %v1301_v11 = vmul.f32 -1.442695, %v1046_v48  ;;  %v968_v53 = vpop.f32.mrb[28].mxu1 }
 0x393   :  { %v2210_v8 = vadd.f32 %v968_v53, %v2145_v30  ;;  %v970_v44 = vpop.f32.mrb[29].mxu1 }
 0x394   :  { %v1537_v12 = vpop.eup %1536  ;;  %1546 = vpow2.f32 %v1301_v11  ;;  %v971_v40 = vadd.f32 %v970_v44, %v2147_v5  ;;  %v972_v6 = vpop.f32.mrb[30].mxu1 }
 0x395   :  { %v1107_v54 = vadd.f32 1.0, %v1537_v12  ;;  %v2216_v20 = vadd.f32 %v972_v6, %v2149_v2  ;;  %v974_v13 = vpop.f32.mrb[31].mxu1  ;;  %v1022_v2 = vadd.f32 %v2213_v18, %v2191_v16 }
 0x396   :  { %v1539_v21 = vpop.eup %1538  ;;  %v1047_v37 = vadd.f32 %v2189_v19, %v971_v40  ;;  %v975_v22 = vadd.f32 %v974_v13, %v2151_v56 }
 0x397   :  { %1548 = vrcp.f32 %v1107_v54  ;;  %v1108_v30 = vadd.f32 1.0, %v1539_v21 }
 0x398   :  { %v1302_v24 = vmul.f32 -1.442695, %v1047_v37  ;;  %v1048_v5 = vadd.f32 %v2189_v19, %v975_v22 }
 0x399   :  { %v1541_v47 = vpop.eup %1540  ;;  %1550 = vrcp.f32 %v1108_v30 }
 0x39a   :  { %1552 = vpow2.f32 %v1302_v24  ;;  %v1303_v29 = vmul.f32 -1.442695, %v1048_v5  ;;  %v978_v28 = vpop.f32.mrb[32].mxu1  ;;  %v1153_v25 = vmul.f32 %v1541_v47, %v1021_v23  ;;  %v1025_v23 = vadd.f32 %v2213_v18, %v2201_v36 }
 0x39b   :  { %v1543_v26 = vpop.eup %1542  ;;  %v2226_v56 = vadd.f32 %v978_v28, %v2153_v35  ;;  %v980_v27 = vpop.f32.mrb[33].mxu1 }
 0x39c   :  { %v1545_v33 = vpop.eup %1544  ;;  %1554 = vpow2.f32 %v1303_v29  ;;  %v981_v38 = vadd.f32 %v980_v27, %v2155_v57  ;;  %v982_v34 = vpop.f32.mrb[34].mxu1  ;;  %v1154_v32 = vmul.f32 %v1543_v26, %v1022_v2 }
 0x39d   :  { %v1109_v31 = vadd.f32 1.0, %v1545_v33  ;;  %v2230_v41 = vadd.f32 %v982_v34, %v2157_v58  ;;  %v984_v16 = vpop.f32.mrb[35].mxu1  ;;  %v1024_v58 = vadd.f32 %v2213_v18, %v2197_v15 }
 0x39e   :  { %v1547_v49 = vpop.eup %1546  ;;  %v1049_v42 = vadd.f32 %v2189_v19, %v981_v38  ;;  %v985_v52 = vadd.f32 %v984_v16, %v2159_v60  ;;  %v1169_v46 = vpack.c.bf16 %v1154_v32, %v1153_v25 }
 0x39f   :  { %1556 = vrcp.f32 %v1109_v31  ;;  %v1110_v35 = vadd.f32 1.0, %v1547_v49 }
 0x3a0   :  { %v1304_v51 = vmul.f32 -1.442695, %v1049_v42  ;;  %v1050_v57 = vadd.f32 %v2189_v19, %v985_v52  ;;  %1370 = vmatpush3.bf16.xpose.msra.mxu0 %v1169_v46  ;;  %v1027_v42 = vadd.f32 %v2213_v18, %v2210_v8 }
 0x3a1   :  { %v1549_v43 = vpop.eup %1548  ;;  %1558 = vrcp.f32 %v1110_v35  ;;  %1371 = vmatprep.subr.bf16.mxu0 %v1771_v61 }
 0x3a2   :  { %1560 = vpow2.f32 %v1304_v51  ;;  %v1305_v10 = vmul.f32 -1.442695, %v1050_v57  ;;  %v988_v60 = vpop.f32.mrb[36].mxu1  ;;  %v1155_v48 = vmul.f32 %v1549_v43, %v1023_v50 }
 0x3a3   :  { %v1551_v11 = vpop.eup %1550  ;;  %v2241_v53 = vadd.f32 %v988_v60, %v2161_v59  ;;  %v990_v14 = vpop.f32.mrb[37].mxu1 }
 0x3a4   :  { %v1553_v44 = vpop.eup %1552  ;;  %1562 = vpow2.f32 %v1305_v10  ;;  %v991_v12 = vadd.f32 %v990_v14, %v2164_v17  ;;  %v992_v40 = vpop.f32.mrb[38].mxu1  ;;  %v1156_v6 = vmul.f32 %v1551_v11, %v1024_v58 }
 0x3a5   :  { %v1111_v54 = vadd.f32 1.0, %v1553_v44  ;;  %v2245_v13 = vadd.f32 %v992_v40, %v2166_v62  ;;  %v994_v15 = vpop.f32.mrb[39].mxu1  ;;  %v1026_v62 = vadd.f32 %v2213_v18, %v2204_v45 }
 0x3a6   :  { %v1555_v21 = vpop.eup %1554  ;;  %v1051_v37 = vadd.f32 %v2189_v19, %v991_v12  ;;  %v995_v22 = vadd.f32 %v994_v15, %v2168_v39  ;;  %v1170_v30 = vpack.c.bf16 %v1156_v6, %v1155_v48 }
 0x3a7   :  { %1564 = vrcp.f32 %v1111_v54  ;;  %v1112_v59 = vadd.f32 1.0, %v1555_v21 }
 0x3a8   :  { %v1306_v24 = vmul.f32 -1.442695, %v1051_v37  ;;  %v1052_v17 = vadd.f32 %v2189_v19, %v995_v22  ;;  %1372 = vmatpush3.bf16.xpose.msra.mxu0 %v1170_v30 }
 0x3a9   :  { %v1557_v5 = vpop.eup %1556  ;;  %1566 = vrcp.f32 %v1112_v59  ;;  %1373 = vmatprep.subr.bf16.mxu0 %v1771_v61 }
 0x3aa   :  { %1568 = vpow2.f32 %v1306_v24  ;;  %v1307_v47 = vmul.f32 -1.442695, %v1052_v17  ;;  %v998_v39 = vpop.f32.mrb[40].mxu1  ;;  %v1157_v2 = vmul.f32 %v1557_v5, %v1025_v23  ;;  %v1031_v24 = vadd.f32 %v2213_v18, %v2241_v53 }
 0x3ab   :  { %v1559_v29 = vpop.eup %1558  ;;  %v2256_v28 = vadd.f32 %v998_v39, %v2170_v63  ;;  %v1000_v36 = vpop.f32.mrb[41].mxu1 }
 0x3ac   :  { %v1561_v25 = vpop.eup %1560  ;;  %1570 = vpow2.f32 %v1307_v47  ;;  %v1001_v26 = vadd.f32 %v1000_v36, %v2172_v0  ;;  %v1002_v27 = vpop.f32.mrb[42].mxu1  ;;  %v1158_v33 = vmul.f32 %v1559_v29, %v1026_v62 }
 0x3ad   :  { %v1113_v38 = vadd.f32 1.0, %v1561_v25  ;;  %v2260_v34 = vadd.f32 %v1002_v27, %v2174_v1  ;;  %v1004_v45 = vpop.f32.mrb[43].mxu1  ;;  %v1028_v1 = vadd.f32 %v2213_v18, %v2216_v20  ;;  %v1033_v53 = vadd.f32 %v2213_v18, %v2256_v28 }
 0x3ae   :  { %v1563_v32 = vpop.eup %1562  ;;  %v1053_v31 = vadd.f32 %v2189_v19, %v1001_v26  ;;  %v1005_v16 = vadd.f32 %v1004_v45, %v2176_v55  ;;  %v1171_v49 = vpack.c.bf16 %v1158_v33, %v1157_v2 }
 0x3af   :  { %1572 = vrcp.f32 %v1113_v38  ;;  %v1114_v63 = vadd.f32 1.0, %v1563_v32 }
 0x3b0   :  { %v1308_v52 = vmul.f32 -1.442695, %v1053_v31  ;;  %v1054_v0 = vadd.f32 %v2189_v19, %v1005_v16  ;;  %1374 = vmatpush3.bf16.xpose.msra.mxu0 %v1171_v49 }
 0x3b1   :  { %v1565_v46 = vpop.eup %1564  ;;  %1574 = vrcp.f32 %v1114_v63  ;;  %1375 = vmatprep.subr.bf16.mxu0 %v1771_v61 }
 0x3b2   :  { %1576 = vpow2.f32 %v1308_v52  ;;  %v1309_v35 = vmul.f32 -1.442695, %v1054_v0  ;;  %v1008_v55 = vpop.f32.mrb[44].mxu1  ;;  %v1159_v50 = vmul.f32 %v1565_v46, %v1027_v42  ;;  %v1177_v52 = vld [vmem:[#allocation11] sm:$0x1] }
 0x3b3   :  { %v1567_v51 = vpop.eup %1566  ;;  %v1009_v57 = vadd.f32 %v1008_v55, %v2178_v3  ;;  %v1010_v43 = vpop.f32.mrb[45].mxu1  ;;  %v1029_v3 = vadd.f32 %v2213_v18, %v2226_v56 }
 0x3b4   :  { %v1569_v8 = vpop.eup %1568  ;;  %1578 = vpow2.f32 %v1309_v35  ;;  %v1011_v58 = vadd.f32 %v1010_v43, %v2180_v4  ;;  %v1012_v10 = vpop.f32.mrb[46].mxu1  ;;  %v1160_v60 = vmul.f32 %v1567_v51, %v1028_v1 }
 0x3b5   :  { %v1115_v48 = vadd.f32 1.0, %v1569_v8  ;;  %v1013_v11 = vadd.f32 %v1012_v10, %v2182_v7  ;;  %v1014_v14 = vpop.f32.mrb[47].mxu1  ;;  %v1030_v7 = vadd.f32 %v2213_v18, %v2230_v41  ;;  %v1032_v41 = vadd.f32 %v2213_v18, %v2245_v13 }
 0x3b6   :  { %v1571_v44 = vpop.eup %1570  ;;  %v1055_v20 = vadd.f32 %v2189_v19, %v1011_v58  ;;  %v1015_v12 = vadd.f32 %v1014_v14, %v2184_v9  ;;  %v1172_v40 = vpack.c.bf16 %v1160_v60, %v1159_v50  ;;  %v1034_v13 = vadd.f32 %v2213_v18, %v2260_v34  ;;  %v1181_v34 = vpop.permute.xlu0 %1180 }
 0x3b7   :  { %1580 = vrcp.f32 %v1115_v48  ;;  %v1116_v6 = vadd.f32 1.0, %v1571_v44  ;;  %v1035_v32 = vadd.f32 %v2213_v18, %v1009_v57  ;;  %v1036_v28 = vadd.f32 %v2213_v18, %v1013_v11 }
 0x3b8   :  { %v1310_v54 = vmul.f32 -1.442695, %v1055_v20  ;;  %v1056_v4 = vadd.f32 %v2189_v19, %v1015_v12  ;;  %1376 = vmatpush3.bf16.xpose.msra.mxu0 %v1172_v40 }
 0x3b9   :  { %v1573_v15 = vpop.eup %1572  ;;  %1582 = vrcp.f32 %v1116_v6  ;;  %1377 = vmatprep.subr.bf16.mxu0 %v1771_v61 }
 0x3ba   :  { %1584 = vpow2.f32 %v1310_v54  ;;  %v1311_v21 = vmul.f32 -1.442695, %v1056_v4  ;;  %v1161_v9 = vmul.f32 %v1573_v15, %v1029_v3 }
 0x3bb   :  { %v1575_v37 = vpop.eup %1574 }
 0x3bc   :  { %v1577_v22 = vpop.eup %1576  ;;  %1586 = vpow2.f32 %v1311_v21  ;;  %v1162_v30 = vmul.f32 %v1575_v37, %v1030_v7 }
 0x3bd   :  { %v1117_v59 = vadd.f32 1.0, %v1577_v22 }
 0x3be   :  { %v1579_v56 = vpop.eup %1578  ;;  %v1173_v23 = vpack.c.bf16 %v1162_v30, %v1161_v9 }
 0x3bf   :  { %1588 = vrcp.f32 %v1117_v59  ;;  %v1118_v19 = vadd.f32 1.0, %v1579_v56 }
 0x3c0   :  { %1378 = vmatpush3.bf16.xpose.msra.mxu0 %v1173_v23 }
 0x3c1   :  { %v1581_v17 = vpop.eup %1580  ;;  %1590 = vrcp.f32 %v1118_v19  ;;  %1379 = vmatprep.subr.bf16.mxu0 %v1771_v61 }
 0x3c2   :  { %v1163_v5 = vmul.f32 %v1581_v17, %v1031_v24 }
 0x3c3   :  { %v1583_v62 = vpop.eup %1582 }
 0x3c4   :  { %v1585_v47 = vpop.eup %1584  ;;  %v1164_v39 = vmul.f32 %v1583_v62, %v1032_v41 }
 0x3c5   :  { %v1119_v2 = vadd.f32 1.0, %v1585_v47 }
 0x3c6   :  { %v1587_v29 = vpop.eup %1586  ;;  %v1174_v36 = vpack.c.bf16 %v1164_v39, %v1163_v5 }
 0x3c7   :  { %1592 = vrcp.f32 %v1119_v2  ;;  %v1120_v25 = vadd.f32 1.0, %v1587_v29 }
 0x3c8   :  { %1380 = vmatpush3.bf16.xpose.msra.mxu0 %v1174_v36 }
 0x3c9   :  { %v1589_v26 = vpop.eup %1588  ;;  %1594 = vrcp.f32 %v1120_v25  ;;  %1381 = vmatprep.subr.bf16.mxu0 %v1771_v61 }
 0x3ca   :  { %v1165_v27 = vmul.f32 %v1589_v26, %v1033_v53 }
 0x3cb   :  { %v1591_v33 = vpop.eup %1590 }
 0x3cc   :  { %v1166_v38 = vmul.f32 %v1591_v33, %v1034_v13 }
 0x3ce   :  { %v1175_v45 = vpack.c.bf16 %v1166_v38, %v1165_v27 }
 0x3d0   :  { %1382 = vmatpush3.bf16.xpose.msra.mxu0 %v1175_v45 }
 0x3d1   :  { %v1593_v31 = vpop.eup %1592  ;;  %1383 = vmatprep.subr.bf16.mxu0 %v1771_v61 }
 0x3d2   :  { %v1167_v16 = vmul.f32 %v1593_v31, %v1035_v32 }
 0x3d3   :  { %v1595_v49 = vpop.eup %1594 }
 0x3d4   :  { %v1168_v63 = vmul.f32 %v1595_v49, %v1036_v28 }
 0x3d6   :  { %v1176_v42 = vpack.c.bf16 %v1168_v63, %v1167_v16 }
 0x3d8   :  { %1384 = vmatpush3.bf16.xpose.msra.mxu0 %v1176_v42 }
 0x3df   :  { %1386 = vmatmul.mubr.bf16.vlgmr.msra.gmra.mrb[32].mxu0 %v1177_v52 }
 0x4b2   :  { %v1217_v0 = vpop.f32.mrb[32].mxu0 }
 0x4b3   :  { %v1387_v46 = vpop.f32.mrb[33].mxu0  ;;  %v1218_v1 = vadd.f32 %v1217_v0, %v1181_v34 }
 0x4b4   :  { %v1220_v35 = vpop.f32.mrb[34].mxu0 }
 0x4b5   :  { %1223 = vst [vmem:[#allocation13] sm:$0x1] %v1218_v1  ;;  %v1388_v55 = vpop.f32.mrb[35].mxu0 }
 0x4b6   :  { %1739 = shalt.err (!%p1736_p10)
}
 0x4b7   :  { %s1740_s25 = scalar_lea.hbm %s2312_s6, 16 }
 0x4b8   :  { %p1741_p11 = scmp.ne.s32.totalorder %s2312_s6, %s1740_s25  ;;  %p1744_p12 = scmp.lt.u32.totalorder %s1740_s25, %s2312_s6 }
 0x4ba   :  { %p1746_p13 = pnand %p1744_p12, %p1741_p11 }
 0x4bc   :  { %1749 = shalt.err (!%p1746_p13)
}
 0x4bd   :  { %1233 = dma.vmem_to_hbm [thread:$0]  %s1231_s14, 16, %s2312_s6, [#allocation4]  }
 0x4be   :  { %1758 = dma.done.wait [#allocation4], 16  }
 0x4bf   :  { %1759 = vsyncadd [#allocation4], 4294967280 }
 0x4c0   :  { %1237 = vsyncpa [#allocation3], 1 }
 0x4c1   :  { %1238 = vsyncpa [#allocation6], 1 }
 0x4c2   :  { %1239 = vsyncpa [#allocation9], 1 }
 0x4c3   :  { %1240 = vsyncpa [#allocation12], 1 }
 0x4c4   :  { %1241 = vsyncpa [#allocation4], 1 }

</bundles_post_ra>
